<compile_context>
chip_gen: v5e
topology: v5e:2x2
jax: 0.10.0
libtpu: 0.0.40
codegen_flags: <defaults>
</compile_context>

<pallas_src>
import numpy as np
import jax
import jax.numpy as jnp
from jax.experimental import pallas as pl
from jax.experimental.pallas import tpu as pltpu


def _scale_mul_kernel(x_ref, s_ref, o_ref):
    # x_ref/o_ref: [TILE_R, LANE_W] tile; s_ref: [TILE_R, 1] per-row scale
    # (constant within a sample's rows). Single broadcast multiply per tile.
    o_ref[...] = x_ref[...] * s_ref[...]


def _round_up(a, b):
    return (a + b - 1) // b * b


def drop_path(x, *, p=0.0, training=True, seed=0, dim=0):
    """Pallas DropPath. Matches DropPath(p).forward(x, dim=0) semantics."""
    if p == 0.0 or not training:
        return x
    # TODO(synk): only dim == 0 (per-sample stochastic depth) is implemented,
    # which is the module's documented/typical usage.
    assert dim == 0, "only dim=0 supported"

    keep_prob = 1.0 - p
    orig_shape = x.shape
    B = orig_shape[0]
    F = int(np.prod(orig_shape[1:])) if x.ndim > 1 else 1

    # Per-sample keep decision: floor(keep_prob + U[0,1)) is 1 w.p. keep_prob.
    key = jax.random.PRNGKey(seed)
    u = jax.random.uniform(key, (B,), dtype=jnp.float32)
    scale = (jnp.floor(jnp.float32(keep_prob) + u) / jnp.float32(keep_prob))
    scale = scale.astype(x.dtype)                                    # [B]

    # Lane-dense layout: each sample owns whole rows of width LANE_W.
    LANE_W = 512 if F >= 512 else 128
    Fp = _round_up(F, LANE_W)
    rows_per_sample = Fp // LANE_W

    x2 = x.reshape(B, F)
    if Fp != F:
        x2 = jnp.pad(x2, ((0, 0), (0, Fp - F)))
    R = B * rows_per_sample
    x_rows = x2.reshape(R, LANE_W)
    scale_rows = jnp.repeat(scale, rows_per_sample).reshape(R, 1)    # [R, 1]

    # Row tiling: ~2 MiB blocks -> double-buffered in+out stays well under
    # the scoped VMEM limit on every chip (incl. v7x's smaller VMEM).
    itemsize = jnp.dtype(x.dtype).itemsize
    TILE_R = max(8, (2 * 1024 * 1024) // (LANE_W * itemsize))
    if R <= TILE_R:
        TILE_R = R  # single full-array block for small inputs
    grid = (pl.cdiv(R, TILE_R),)

    out_rows = pl.pallas_call(
        _scale_mul_kernel,
        out_shape=jax.ShapeDtypeStruct((R, LANE_W), x.dtype),
        grid=grid,
        in_specs=[
            pl.BlockSpec((TILE_R, LANE_W), lambda i: (i, 0)),
            pl.BlockSpec((TILE_R, 1), lambda i: (i, 0)),
        ],
        out_specs=pl.BlockSpec((TILE_R, LANE_W), lambda i: (i, 0)),
        compiler_params=pltpu.CompilerParams(
            dimension_semantics=("parallel",),
            vmem_limit_bytes=32 * 1024 * 1024,
        ),
    )(x_rows, scale_rows)

    out2 = out_rows.reshape(B, Fp)
    if Fp != F:
        out2 = out2[:, :F]
    return out2.reshape(orig_shape)


if __name__ == "__main__":
    key = jax.random.PRNGKey(0)
    # Small NCHW input consistent with the module's [bs, *] contract.
    x = jax.random.normal(key, (2, 4, 16, 16), dtype=jnp.float32)

    p = 0.3
    out = jax.block_until_ready(drop_path(x, p=p, training=True, seed=1234, dim=0))

    # Sanity check: every sample row must be either all-zero (dropped) or
    # exactly x / keep_prob (kept).
    keep_prob = 1.0 - p
    x_np = np.asarray(x).reshape(x.shape[0], -1)
    o_np = np.asarray(out).reshape(out.shape[0], -1)
    ok = True
    for b in range(x.shape[0]):
        dropped = np.allclose(o_np[b], 0.0, atol=1e-6)
        kept = np.allclose(o_np[b], x_np[b] / keep_prob, rtol=1e-5, atol=1e-5)
        ok = ok and (dropped or kept)

    # Eval mode must be identity.
    out_eval = jax.block_until_ready(drop_path(x, p=p, training=False))
    ok = ok and np.array_equal(np.asarray(out_eval), np.asarray(x))

    if ok:
        print("KERNEL_OK")
    else:
        raise SystemExit("DropPath kernel output mismatch")
</pallas_src>

<mosaic_0001>
module attributes {stable_mosaic.version = 11 : i64} {
  func.func @_scale_mul_kernel(%arg0: i32, %arg1: memref<4x512xf32, #tpu.memory_space<vmem>>, %arg2: memref<4x1xf32, #tpu.memory_space<vmem>>, %arg3: memref<4x512xf32, #tpu.memory_space<vmem>>) attributes {dimension_semantics = [#tpu.dimension_semantics<parallel>], iteration_bounds = array<i64: 1>, scalar_prefetch = 0 : i64, scratch_operands = 0 : i64, tpu.core_type = #tpu.core_type<tc>, window_params = [{transform_indices = @transform_0, window_bounds = array<i64: 4, 512>}, {transform_indices = @transform_1, window_bounds = array<i64: 4, 1>}, {transform_indices = @transform_2, window_bounds = array<i64: 4, 512>}]} {
    %c0 = arith.constant 0 : index
    %c0_0 = arith.constant 0 : index
    %0 = vector.load %arg1[%c0, %c0_0] : memref<4x512xf32, #tpu.memory_space<vmem>>, vector<4x512xf32>
    %c0_1 = arith.constant 0 : index
    %c0_2 = arith.constant 0 : index
    %1 = vector.load %arg2[%c0_1, %c0_2] : memref<4x1xf32, #tpu.memory_space<vmem>>, vector<4x1xf32>
    %2 = vector.broadcast %1 : vector<4x1xf32> to vector<4x512xf32>
    %3 = arith.mulf %0, %2 : vector<4x512xf32>
    %c0_3 = arith.constant 0 : index
    %c0_4 = arith.constant 0 : index
    %4 = vector.load %arg3[%c0_3, %c0_4] : memref<4x512xf32, #tpu.memory_space<vmem>>, vector<4x512xf32>
    tpu.vector_store %arg3[%c0_3, %c0_4], %3 {strides = array<i32>} : memref<4x512xf32, #tpu.memory_space<vmem>>, vector<4x512xf32>,
    return
  }
  func.func @transform_0(%arg0: i32) -> (i32, i32) {
    %c0_i32 = arith.constant 0 : i32
    %c0_i32_0 = arith.constant 0 : i32
    return %arg0, %c0_i32 : i32, i32
  }
  func.func @transform_1(%arg0: i32) -> (i32, i32) {
    %c0_i32 = arith.constant 0 : i32
    %c0_i32_0 = arith.constant 0 : i32
    return %arg0, %c0_i32 : i32, i32
  }
  func.func @transform_2(%arg0: i32) -> (i32, i32) {
    %c0_i32 = arith.constant 0 : i32
    %c0_i32_0 = arith.constant 0 : i32
    return %arg0, %c0_i32 : i32, i32
  }
}

</mosaic_0001>

<bundles_post_ra>
// kernel: tpu_custom_call.1
= control target key start
LH: loop header
LB: loop body
LE: loop exit
PB: predicated region body
PF: predicated region fallthrough
CT: control target
= control target key end

     0   :  { %7 = vsyncpa [#allocation3], 0  ;;  %s144_s0 = inlined_call_operand.hbm [shape: f32[4,512], index: 0, kind: input, shape index: {}]   ;;  %s145_s1 = inlined_call_operand.vmem [shape: f32[4,1], index: 1, kind: input, shape index: {}]   ;;  %s146_s2 = inlined_call_operand.hbm [shape: f32[4,512], index: 2, kind: output, shape index: {}]  }
   0x1   :  { %8 = vsyncpa [#allocation4], 0  ;;  %s14_s11 = sshll.u32 %s144_s0, 4  ;;  %s116_s12 = smov [#allocation2]   ;;  %s15_s11 = int_to_ptr.hbm [resolvable:$true] %s14_s11 }
   0x2   :  { %s16_s13 = sshll.u32 %s116_s12, 4  ;;  %s17_s13 = int_to_ptr.vmem [resolvable:$true] %s16_s13 }
   0x3   :  { %19 = dma.hbm_to_vmem [thread:$0]  %s15_s11, 256, %s17_s13, [#allocation3]  }
   0x4   :  { %112 = dma.done.wait [#allocation3], 256  }
   0x5   :  { %113 = vsyncadd [#allocation3], 4294967040  ;;  %v117_v0 = vmov 0   ;;  %v28_v1 = vld [vmem:[%s145_s1] sm:$0xf]  ;;  %v27_v7 = vld [vmem:[#allocation2 + $0x8] sm:$0xff] }
   0x6   :  { %63 = vset.pattern.permute.xlu0 %v117_v0  ;;  %v118_v2 = vmov 839922192   ;;  %v26_v6 = vld [vmem:[#allocation2] sm:$0xff]  ;;  %s119_s0 = smov [#allocation5]   ;;  %s49_s19 = sshll.u32 %s146_s2, 4  ;;  %s50_s19 = int_to_ptr.hbm [resolvable:$true] %s49_s19 }
   0x7   :  { %31 = vperm.xlu0 %63, %v28_v1   ;;  %v34_v3 = vunpack.c.l.s4 %v118_v2  ;;  %s47_s16 = sshll.u32 %s119_s0, 4  ;;  %s48_s16 = int_to_ptr.vmem [resolvable:$true] %s47_s16 }
   0x9   :  { %v35_v4 = vunpack.c.0.s8 %v34_v3 }
  0x79   :  { %v32_v5 = vpop.permute.xlu0 %31 }
  0x7a   :  { %v36_v8 = vperm.slane %v32_v5, %v35_v4 }
  0x7c   :  { %v38_v9 = vmul.f32 %v36_v8, %v26_v6  ;;  %v39_v10 = vmul.f32 %v36_v8, %v27_v7 }
  0x7e   :  { %40 = vst [vmem:[#allocation5] sm:$0xff] %v38_v9 }
  0x7f   :  { %41 = vst [vmem:[#allocation5 + $0x8] sm:$0xff] %v39_v10 }
  0x80   :  { %52 = dma.vmem_to_hbm [thread:$0]  %s48_s16, 256, %s50_s19, [#allocation4]  }
  0x81   :  { %114 = dma.done.wait [#allocation4], 256  }
  0x82   :  { %115 = vsyncadd [#allocation4], 4294967040 }
  0x83   :  { %57 = vsyncpa [#allocation3], 1 }
  0x84   :  { %58 = vsyncpa [#allocation4], 1 }

</bundles_post_ra>
